<compile_context>
chip_gen: v5e
topology: v5e:2x2
jax: 0.10.0
libtpu: 0.0.40
codegen_flags: <defaults>
</compile_context>

<pallas_src>
from functools import partial

import jax
import jax.numpy as jnp
from jax.experimental import pallas as pl
from jax.experimental.pallas import tpu as pltpu

FEATS = 1
N_WINDOW = 5
N = FEATS * N_WINDOW            # 5
N_HIDDEN = 16
N_LATENT = 8
N_GMM = FEATS * N_WINDOW        # 5
Z_DIM = N_LATENT + 2            # 10
OUT_ROWS = Z_DIM + N + N_GMM    # 20  (z | x_hat | gamma)
EPS = 1e-8

# Torch Linear layout [out_features, in_features] per layer.
LAYER_DIMS = (
    (N_HIDDEN, N), (N_HIDDEN, N_HIDDEN), (N_LATENT, N_HIDDEN),      # encoder
    (N_HIDDEN, N_LATENT), (N_HIDDEN, N_HIDDEN), (N, N_HIDDEN),      # decoder
    (N_HIDDEN, Z_DIM), (N_GMM, N_HIDDEN),                           # estimate
)
N_LAYERS = len(LAYER_DIMS)
PACK_OUT = 16                   # max out_features
PACK_IN = 16                    # max in_features
BIAS_COL = PACK_IN              # bias lives in column 16 of the packed buffer


def _round_up(n, m):
    return ((n + m - 1) // m) * m


def _cdiv(a, b):
    return -(-a // b)


def dagmm_kernel(x_ref, p_ref, out_ref):
    # p_ref: [N_LAYERS, 16, 17] packed params (weights [out,in] + bias col 16).
    def w_full(l):
        return p_ref[l, :, 0:PACK_IN]                           # [16, 16]

    def bias(l):
        return p_ref[l, :, BIAS_COL:BIAS_COL + 1]               # [16, 1]

    x = x_ref[...]                                              # [5, BT]

    # ---- encoder: Linear(5,16)+tanh, Linear(16,16)+tanh, Linear(16,8) ----
    h = jnp.tanh(jnp.dot(p_ref[0, :, 0:N], x,
                         preferred_element_type=jnp.float32) + bias(0))
    h = jnp.tanh(jnp.dot(w_full(1), h,
                         preferred_element_type=jnp.float32) + bias(1))
    # Rows 8:16 of z16 are exactly zero (zero weight rows + zero bias).
    z16 = jnp.dot(w_full(2), h, preferred_element_type=jnp.float32) + bias(2)

    # ---- decoder: Linear(8,16)+tanh, Linear(16,16)+tanh, Linear(16,5)+sigmoid
    d = jnp.tanh(jnp.dot(w_full(3), z16,
                         preferred_element_type=jnp.float32) + bias(3))
    d = jnp.tanh(jnp.dot(w_full(4), d,
                         preferred_element_type=jnp.float32) + bias(4))
    xh_pre = jnp.dot(w_full(5), d, preferred_element_type=jnp.float32) + bias(5)
    x_hat = jax.nn.sigmoid(xh_pre[0:N, :])                      # [5, BT]

    # ---- reconstruction features (reduce over the feature / sublane axis) ----
    diff = x - x_hat
    x_sq = jnp.sum(x * x, axis=0, keepdims=True)                # [1, BT]
    xh_sq = jnp.sum(x_hat * x_hat, axis=0, keepdims=True)
    diff_sq = jnp.sum(diff * diff, axis=0, keepdims=True)
    xdot = jnp.sum(x * x_hat, axis=0, keepdims=True)
    # eps guard so zero input columns (batch padding) stay finite; matches
    # F.cosine_similarity's per-norm clamp at 1e-8 for rec2.
    x_sq_c = jnp.maximum(x_sq, EPS * EPS)
    xh_sq_c = jnp.maximum(xh_sq, EPS * EPS)
    rec1 = jnp.sqrt(diff_sq / x_sq_c)                           # rel. eucl. dist
    rec2 = xdot * jax.lax.rsqrt(x_sq_c * xh_sq_c)               # cosine sim

    # ---- estimate: Linear(10,16)+tanh, Dropout(0.5), Linear(16,5), Softmax ----
    # First matmul split algebraically over [z_c | rec1 | rec2]; the full 16x16
    # weight tile against z16 yields exactly W[:, 0:8] @ z_c because rows 8:16
    # of z16 are zero.
    e = jnp.tanh(
        jnp.dot(w_full(6), z16, preferred_element_type=jnp.float32)
        + p_ref[6, :, N_LATENT:N_LATENT + 1] * rec1
        + p_ref[6, :, N_LATENT + 1:N_LATENT + 2] * rec2
        + bias(6))
    # TODO(synk): Dropout(p=0.5) implemented with eval-mode semantics (identity).
    logits = (jnp.dot(w_full(7), e, preferred_element_type=jnp.float32)
              + bias(7))[0:N_GMM, :]                            # [5, BT]
    m = jnp.max(logits, axis=0, keepdims=True)
    pexp = jnp.exp(logits - m)
    gamma = pexp * pl.reciprocal(jnp.sum(pexp, axis=0, keepdims=True),
                                 approx=True)

    # Single packed output block: [z_c ; rec1 ; rec2 ; x_hat ; gamma] = 20 rows.
    out_ref[...] = jnp.concatenate(
        [z16[0:N_LATENT, :], rec1, rec2, x_hat, gamma], axis=0)


def pack_params(params):
    """Pack 8 (W [out,in], b [out]) torch-layout layers into one [8,16,17] f32."""
    packed = jnp.zeros((N_LAYERS, PACK_OUT, PACK_IN + 1), jnp.float32)
    for l, (w, b) in enumerate(params):
        o, i = w.shape
        packed = packed.at[l, :o, :i].set(w.astype(jnp.float32))
        packed = packed.at[l, :o, BIAS_COL].set(b.astype(jnp.float32))
    return packed


def _choose_tiles(B, max_tile):
    """Balanced batch tiling: multiple of 128, <128 cols padding waste per tile,
    and >=2 (even) grid steps when B is large so v7x megacore splits the work."""
    n_tiles = _cdiv(B, max_tile)
    if B > 256 and n_tiles < 2:
        n_tiles = 2
    if n_tiles > 1 and n_tiles % 2:
        n_tiles += 1
    bt = max(128, _round_up(_cdiv(B, n_tiles), 128))
    bp = _round_up(B, bt)
    return bt, bp


@partial(jax.jit, static_argnames=("bt", "bp"))
def _dagmm_impl(x2, params, *, bt, bp):
    B = x2.shape[0]
    packed = pack_params(params)

    # Batch on the lane (last) dim; zero-pad the batch to a tile multiple.
    # (jit-fused with the kernel's input DMA producer / output consumers.)
    x_t = jnp.zeros((N, bp), jnp.float32).at[:, :B].set(x2.T)

    grid = (bp // bt,)
    col_spec = lambda rows: pl.BlockSpec((rows, bt), lambda i: (0, i))
    param_spec = pl.BlockSpec((N_LAYERS, PACK_OUT, PACK_IN + 1),
                              lambda i: (0, 0, 0))   # resident across the grid

    flops = 2 * bp * sum(o * i for o, i in LAYER_DIMS)
    transcendentals = bp * (5 * N_HIDDEN + N + N_GMM + 4)   # tanh/sigm/exp/sqrt
    bytes_accessed = 4 * (bp * (N + OUT_ROWS)
                          + N_LAYERS * PACK_OUT * (PACK_IN + 1))

    out = pl.pallas_call(
        dagmm_kernel,
        grid=grid,
        in_specs=[col_spec(N), param_spec],
        out_specs=col_spec(OUT_ROWS),
        out_shape=jax.ShapeDtypeStruct((OUT_ROWS, bp), jnp.float32),
        compiler_params=pltpu.CompilerParams(
            dimension_semantics=("parallel",),
            vmem_limit_bytes=32 * 1024 * 1024),
        cost_estimate=pl.CostEstimate(
            flops=int(flops),
            transcendentals=int(transcendentals),
            bytes_accessed=int(bytes_accessed)),
    )(x_t, packed)

    z = out[0:Z_DIM, :B].T                                  # [B, 10]
    z_c = z[:, 0:N_LATENT]                                  # rows 0:8 of z
    x_hat = out[Z_DIM:Z_DIM + N, :B].T.reshape(-1)
    gamma = out[Z_DIM + N:OUT_ROWS, :B].T.reshape(-1)
    return z_c, x_hat, z, gamma


def dagmm_forward(x, params, *, max_tile=8192):
    """Mirrors DAGMM.forward: returns (z_c, x_hat.ravel(), z, gamma.ravel())."""
    x2 = jnp.asarray(x, jnp.float32).reshape(-1, N)
    B = x2.shape[0]
    bt, bp = _choose_tiles(B, max_tile)
    return _dagmm_impl(x2, params, bt=bt, bp=bp)


def init_params(key):
    """Deterministic PyTorch-style Linear init: U(-1/sqrt(fan_in), 1/sqrt(fan_in)).

    Weights are kept in torch layout [out_features, in_features]."""
    keys = jax.random.split(key, N_LAYERS)
    params = []
    for k, (fo, fi) in zip(keys, LAYER_DIMS):
        k_w, k_b = jax.random.split(k)
        bound = float(1.0 / (fi ** 0.5))
        w = jax.random.uniform(k_w, (fo, fi), jnp.float32, -bound, bound)
        b = jax.random.uniform(k_b, (fo,), jnp.float32, -bound, bound)
        params.append((w, b))
    return tuple(params)


if __name__ == "__main__":
    key = jax.random.PRNGKey(0)
    k_x, k_p = jax.random.split(key)

    # 8 windows of (n_window=5, feats=1) -> viewed internally as (-1, 5)
    x = jax.random.uniform(k_x, (8, N_WINDOW * FEATS), jnp.float32)
    params = init_params(k_p)

    z_c, x_hat_flat, z, gamma_flat = dagmm_forward(x, params)
    jax.block_until_ready((z_c, x_hat_flat, z, gamma_flat))

    assert z_c.shape == (8, N_LATENT)
    assert x_hat_flat.shape == (8 * N,)
    assert z.shape == (8, Z_DIM)
    assert gamma_flat.shape == (8 * N_GMM,)
    assert bool(jnp.all(jnp.isfinite(z)))
    assert bool(jnp.all(jnp.isfinite(x_hat_flat)))
    assert bool(jnp.all(jnp.isfinite(gamma_flat)))
    # z_c is rows 0:8 of z by construction
    assert bool(jnp.allclose(z[:, :N_LATENT], z_c))
    # softmax rows sum to ~1 (approx reciprocal in the normalizer)
    assert bool(jnp.allclose(gamma_flat.reshape(-1, N_GMM).sum(axis=1), 1.0,
                             atol=1e-2))

    print("KERNEL_OK")
</pallas_src>

<mosaic_0001>
module attributes {stable_mosaic.version = 11 : i64} {
  func.func @dagmm_kernel(%arg0: i32, %arg1: memref<5x128xf32, #tpu.memory_space<vmem>>, %arg2: memref<8x16x17xf32, #tpu.memory_space<vmem>>, %arg3: memref<20x128xf32, #tpu.memory_space<vmem>>) attributes {dimension_semantics = [#tpu.dimension_semantics<parallel>], iteration_bounds = array<i64: 1>, scalar_prefetch = 0 : i64, scratch_operands = 0 : i64, tpu.core_type = #tpu.core_type<tc>, window_params = [{transform_indices = @transform_0, window_bounds = array<i64: 5, 128>}, {pipeline_mode = #tpu.pipeline_mode<synchronous>, transform_indices = @transform_1, window_bounds = array<i64: 8, 16, 17>}, {transform_indices = @transform_2, window_bounds = array<i64: 20, 128>}]} {
    %c0 = arith.constant 0 : index
    %c0_0 = arith.constant 0 : index
    %0 = vector.load %arg1[%c0, %c0_0] : memref<5x128xf32, #tpu.memory_space<vmem>>, vector<5x128xf32>
    %c0_1 = arith.constant 0 : index
    %c0_2 = arith.constant 0 : index
    %c0_3 = arith.constant 0 : index
    %1 = vector.load %arg2[%c0_1, %c0_2, %c0_3] : memref<8x16x17xf32, #tpu.memory_space<vmem>>, vector<1x16x5xf32>
    %2 = vector.shape_cast %1 : vector<1x16x5xf32> to vector<16x5xf32>
    %cst = arith.constant dense<0.000000e+00> : vector<16x128xf32>
    %3 = tpu.matmul %2, %0, %cst {dimension_numbers = #tpu.dot_dimension_numbers<[1], [0], [0], [1], [0, 0, 1, 1], [], []>} : vector<16x5xf32>, vector<5x128xf32>, vector<16x128xf32> -> vector<16x128xf32>
    %c0_4 = arith.constant 0 : index
    %c0_5 = arith.constant 0 : index
    %c16 = arith.constant 16 : index
    %4 = vector.load %arg2[%c0_4, %c0_5, %c16] : memref<8x16x17xf32, #tpu.memory_space<vmem>>, vector<1x16x1xf32>
    %5 = vector.shape_cast %4 : vector<1x16x1xf32> to vector<16x1xf32>
    %6 = vector.broadcast %5 : vector<16x1xf32> to vector<16x128xf32>
    %7 = arith.addf %3, %6 : vector<16x128xf32>
    %8 = math.tanh %7 : vector<16x128xf32>
    %c1 = arith.constant 1 : index
    %c0_6 = arith.constant 0 : index
    %c0_7 = arith.constant 0 : index
    %9 = vector.load %arg2[%c1, %c0_6, %c0_7] : memref<8x16x17xf32, #tpu.memory_space<vmem>>, vector<1x16x16xf32>
    %10 = vector.shape_cast %9 : vector<1x16x16xf32> to vector<16x16xf32>
    %cst_8 = arith.constant dense<0.000000e+00> : vector<16x128xf32>
    %11 = tpu.matmul %10, %8, %cst_8 {dimension_numbers = #tpu.dot_dimension_numbers<[1], [0], [0], [1], [0, 0, 1, 1], [], []>} : vector<16x16xf32>, vector<16x128xf32>, vector<16x128xf32> -> vector<16x128xf32>
    %c1_9 = arith.constant 1 : index
    %c0_10 = arith.constant 0 : index
    %c16_11 = arith.constant 16 : index
    %12 = vector.load %arg2[%c1_9, %c0_10, %c16_11] : memref<8x16x17xf32, #tpu.memory_space<vmem>>, vector<1x16x1xf32>
    %13 = vector.shape_cast %12 : vector<1x16x1xf32> to vector<16x1xf32>
    %14 = vector.broadcast %13 : vector<16x1xf32> to vector<16x128xf32>
    %15 = arith.addf %11, %14 : vector<16x128xf32>
    %16 = math.tanh %15 : vector<16x128xf32>
    %c2 = arith.constant 2 : index
    %c0_12 = arith.constant 0 : index
    %c0_13 = arith.constant 0 : index
    %17 = vector.load %arg2[%c2, %c0_12, %c0_13] : memref<8x16x17xf32, #tpu.memory_space<vmem>>, vector<1x16x16xf32>
    %18 = vector.shape_cast %17 : vector<1x16x16xf32> to vector<16x16xf32>
    %cst_14 = arith.constant dense<0.000000e+00> : vector<16x128xf32>
    %19 = tpu.matmul %18, %16, %cst_14 {dimension_numbers = #tpu.dot_dimension_numbers<[1], [0], [0], [1], [0, 0, 1, 1], [], []>} : vector<16x16xf32>, vector<16x128xf32>, vector<16x128xf32> -> vector<16x128xf32>
    %c2_15 = arith.constant 2 : index
    %c0_16 = arith.constant 0 : index
    %c16_17 = arith.constant 16 : index
    %20 = vector.load %arg2[%c2_15, %c0_16, %c16_17] : memref<8x16x17xf32, #tpu.memory_space<vmem>>, vector<1x16x1xf32>
    %21 = vector.shape_cast %20 : vector<1x16x1xf32> to vector<16x1xf32>
    %22 = vector.broadcast %21 : vector<16x1xf32> to vector<16x128xf32>
    %23 = arith.addf %19, %22 : vector<16x128xf32>
    %c3 = arith.constant 3 : index
    %c0_18 = arith.constant 0 : index
    %c0_19 = arith.constant 0 : index
    %24 = vector.load %arg2[%c3, %c0_18, %c0_19] : memref<8x16x17xf32, #tpu.memory_space<vmem>>, vector<1x16x16xf32>
    %25 = vector.shape_cast %24 : vector<1x16x16xf32> to vector<16x16xf32>
    %cst_20 = arith.constant dense<0.000000e+00> : vector<16x128xf32>
    %26 = tpu.matmul %25, %23, %cst_20 {dimension_numbers = #tpu.dot_dimension_numbers<[1], [0], [0], [1], [0, 0, 1, 1], [], []>} : vector<16x16xf32>, vector<16x128xf32>, vector<16x128xf32> -> vector<16x128xf32>
    %c3_21 = arith.constant 3 : index
    %c0_22 = arith.constant 0 : index
    %c16_23 = arith.constant 16 : index
    %27 = vector.load %arg2[%c3_21, %c0_22, %c16_23] : memref<8x16x17xf32, #tpu.memory_space<vmem>>, vector<1x16x1xf32>
    %28 = vector.shape_cast %27 : vector<1x16x1xf32> to vector<16x1xf32>
    %29 = vector.broadcast %28 : vector<16x1xf32> to vector<16x128xf32>
    %30 = arith.addf %26, %29 : vector<16x128xf32>
    %31 = math.tanh %30 : vector<16x128xf32>
    %c4 = arith.constant 4 : index
    %c0_24 = arith.constant 0 : index
    %c0_25 = arith.constant 0 : index
    %32 = vector.load %arg2[%c4, %c0_24, %c0_25] : memref<8x16x17xf32, #tpu.memory_space<vmem>>, vector<1x16x16xf32>
    %33 = vector.shape_cast %32 : vector<1x16x16xf32> to vector<16x16xf32>
    %cst_26 = arith.constant dense<0.000000e+00> : vector<16x128xf32>
    %34 = tpu.matmul %33, %31, %cst_26 {dimension_numbers = #tpu.dot_dimension_numbers<[1], [0], [0], [1], [0, 0, 1, 1], [], []>} : vector<16x16xf32>, vector<16x128xf32>, vector<16x128xf32> -> vector<16x128xf32>
    %c4_27 = arith.constant 4 : index
    %c0_28 = arith.constant 0 : index
    %c16_29 = arith.constant 16 : index
    %35 = vector.load %arg2[%c4_27, %c0_28, %c16_29] : memref<8x16x17xf32, #tpu.memory_space<vmem>>, vector<1x16x1xf32>
    %36 = vector.shape_cast %35 : vector<1x16x1xf32> to vector<16x1xf32>
    %37 = vector.broadcast %36 : vector<16x1xf32> to vector<16x128xf32>
    %38 = arith.addf %34, %37 : vector<16x128xf32>
    %39 = math.tanh %38 : vector<16x128xf32>
    %c5 = arith.constant 5 : index
    %c0_30 = arith.constant 0 : index
    %c0_31 = arith.constant 0 : index
    %40 = vector.load %arg2[%c5, %c0_30, %c0_31] : memref<8x16x17xf32, #tpu.memory_space<vmem>>, vector<1x16x16xf32>
    %41 = vector.shape_cast %40 : vector<1x16x16xf32> to vector<16x16xf32>
    %cst_32 = arith.constant dense<0.000000e+00> : vector<16x128xf32>
    %42 = tpu.matmul %41, %39, %cst_32 {dimension_numbers = #tpu.dot_dimension_numbers<[1], [0], [0], [1], [0, 0, 1, 1], [], []>} : vector<16x16xf32>, vector<16x128xf32>, vector<16x128xf32> -> vector<16x128xf32>
    %c5_33 = arith.constant 5 : index
    %c0_34 = arith.constant 0 : index
    %c16_35 = arith.constant 16 : index
    %43 = vector.load %arg2[%c5_33, %c0_34, %c16_35] : memref<8x16x17xf32, #tpu.memory_space<vmem>>, vector<1x16x1xf32>
    %44 = vector.shape_cast %43 : vector<1x16x1xf32> to vector<16x1xf32>
    %45 = vector.broadcast %44 : vector<16x1xf32> to vector<16x128xf32>
    %46 = arith.addf %42, %45 : vector<16x128xf32>
    %47 = vector.extract_strided_slice %46 {offsets = [0, 0], sizes = [5, 128], strides = [1, 1]} : vector<16x128xf32> to vector<5x128xf32>
    %48 = arith.negf %47 : vector<5x128xf32>
    %49 = math.exp %48 : vector<5x128xf32>
    %cst_36 = arith.constant 1.000000e+00 : f32
    %50 = vector.broadcast %cst_36 : f32 to vector<5x128xf32>
    %51 = arith.addf %50, %49 : vector<5x128xf32>
    %52 = arith.divf %50, %51 : vector<5x128xf32>
    %53 = arith.subf %0, %52 : vector<5x128xf32>
    %54 = arith.mulf %0, %0 : vector<5x128xf32>
    %cst_37 = arith.constant dense<0.000000e+00> : vector<128xf32>
    %55 = vector.multi_reduction <add>, %54, %cst_37 [0] : vector<5x128xf32> to vector<128xf32>
    %56 = vector.shape_cast %55 : vector<128xf32> to vector<1x128xf32>
    %57 = arith.mulf %52, %52 : vector<5x128xf32>
    %cst_38 = arith.constant dense<0.000000e+00> : vector<128xf32>
    %58 = vector.multi_reduction <add>, %57, %cst_38 [0] : vector<5x128xf32> to vector<128xf32>
    %59 = vector.shape_cast %58 : vector<128xf32> to vector<1x128xf32>
    %60 = arith.mulf %53, %53 : vector<5x128xf32>
    %cst_39 = arith.constant dense<0.000000e+00> : vector<128xf32>
    %61 = vector.multi_reduction <add>, %60, %cst_39 [0] : vector<5x128xf32> to vector<128xf32>
    %62 = vector.shape_cast %61 : vector<128xf32> to vector<1x128xf32>
    %63 = arith.mulf %0, %52 : vector<5x128xf32>
    %cst_40 = arith.constant dense<0.000000e+00> : vector<128xf32>
    %64 = vector.multi_reduction <add>, %63, %cst_40 [0] : vector<5x128xf32> to vector<128xf32>
    %65 = vector.shape_cast %64 : vector<128xf32> to vector<1x128xf32>
    %cst_41 = arith.constant 1.000000e-16 : f32
    %66 = vector.broadcast %cst_41 : f32 to vector<1x128xf32>
    %67 = arith.maximumf %56, %66 : vector<1x128xf32>
    %cst_42 = arith.constant 1.000000e-16 : f32
    %68 = vector.broadcast %cst_42 : f32 to vector<1x128xf32>
    %69 = arith.maximumf %59, %68 : vector<1x128xf32>
    %70 = arith.divf %62, %67 : vector<1x128xf32>
    %71 = math.sqrt %70 : vector<1x128xf32>
    %72 = arith.mulf %67, %69 : vector<1x128xf32>
    %73 = math.rsqrt %72 : vector<1x128xf32>
    %74 = arith.mulf %65, %73 : vector<1x128xf32>
    %c6 = arith.constant 6 : index
    %c0_43 = arith.constant 0 : index
    %c0_44 = arith.constant 0 : index
    %75 = vector.load %arg2[%c6, %c0_43, %c0_44] : memref<8x16x17xf32, #tpu.memory_space<vmem>>, vector<1x16x16xf32>
    %76 = vector.shape_cast %75 : vector<1x16x16xf32> to vector<16x16xf32>
    %cst_45 = arith.constant dense<0.000000e+00> : vector<16x128xf32>
    %77 = tpu.matmul %76, %23, %cst_45 {dimension_numbers = #tpu.dot_dimension_numbers<[1], [0], [0], [1], [0, 0, 1, 1], [], []>} : vector<16x16xf32>, vector<16x128xf32>, vector<16x128xf32> -> vector<16x128xf32>
    %c6_46 = arith.constant 6 : index
    %c0_47 = arith.constant 0 : index
    %c8 = arith.constant 8 : index
    %78 = vector.load %arg2[%c6_46, %c0_47, %c8] : memref<8x16x17xf32, #tpu.memory_space<vmem>>, vector<1x16x1xf32>
    %79 = vector.shape_cast %78 : vector<1x16x1xf32> to vector<16x1xf32>
    %80 = vector.broadcast %79 : vector<16x1xf32> to vector<16x128xf32>
    %81 = vector.broadcast %71 : vector<1x128xf32> to vector<16x128xf32>
    %82 = arith.mulf %80, %81 : vector<16x128xf32>
    %83 = arith.addf %77, %82 : vector<16x128xf32>
    %c6_48 = arith.constant 6 : index
    %c0_49 = arith.constant 0 : index
    %c9 = arith.constant 9 : index
    %84 = vector.load %arg2[%c6_48, %c0_49, %c9] : memref<8x16x17xf32, #tpu.memory_space<vmem>>, vector<1x16x1xf32>
    %85 = vector.shape_cast %84 : vector<1x16x1xf32> to vector<16x1xf32>
    %86 = vector.broadcast %85 : vector<16x1xf32> to vector<16x128xf32>
    %87 = vector.broadcast %74 : vector<1x128xf32> to vector<16x128xf32>
    %88 = arith.mulf %86, %87 : vector<16x128xf32>
    %89 = arith.addf %83, %88 : vector<16x128xf32>
    %c6_50 = arith.constant 6 : index
    %c0_51 = arith.constant 0 : index
    %c16_52 = arith.constant 16 : index
    %90 = vector.load %arg2[%c6_50, %c0_51, %c16_52] : memref<8x16x17xf32, #tpu.memory_space<vmem>>, vector<1x16x1xf32>
    %91 = vector.shape_cast %90 : vector<1x16x1xf32> to vector<16x1xf32>
    %92 = vector.broadcast %91 : vector<16x1xf32> to vector<16x128xf32>
    %93 = arith.addf %89, %92 : vector<16x128xf32>
    %94 = math.tanh %93 : vector<16x128xf32>
    %c7 = arith.constant 7 : index
    %c0_53 = arith.constant 0 : index
    %c0_54 = arith.constant 0 : index
    %95 = vector.load %arg2[%c7, %c0_53, %c0_54] : memref<8x16x17xf32, #tpu.memory_space<vmem>>, vector<1x16x16xf32>
    %96 = vector.shape_cast %95 : vector<1x16x16xf32> to vector<16x16xf32>
    %cst_55 = arith.constant dense<0.000000e+00> : vector<16x128xf32>
    %97 = tpu.matmul %96, %94, %cst_55 {dimension_numbers = #tpu.dot_dimension_numbers<[1], [0], [0], [1], [0, 0, 1, 1], [], []>} : vector<16x16xf32>, vector<16x128xf32>, vector<16x128xf32> -> vector<16x128xf32>
    %c7_56 = arith.constant 7 : index
    %c0_57 = arith.constant 0 : index
    %c16_58 = arith.constant 16 : index
    %98 = vector.load %arg2[%c7_56, %c0_57, %c16_58] : memref<8x16x17xf32, #tpu.memory_space<vmem>>, vector<1x16x1xf32>
    %99 = vector.shape_cast %98 : vector<1x16x1xf32> to vector<16x1xf32>
    %100 = vector.broadcast %99 : vector<16x1xf32> to vector<16x128xf32>
    %101 = arith.addf %97, %100 : vector<16x128xf32>
    %102 = vector.extract_strided_slice %101 {offsets = [0, 0], sizes = [5, 128], strides = [1, 1]} : vector<16x128xf32> to vector<5x128xf32>
    %cst_59 = arith.constant dense<0xFF800000> : vector<128xf32>
    %103 = vector.multi_reduction <maximumf>, %102, %cst_59 [0] : vector<5x128xf32> to vector<128xf32>
    %104 = vector.shape_cast %103 : vector<128xf32> to vector<1x128xf32>
    %105 = vector.broadcast %104 : vector<1x128xf32> to vector<5x128xf32>
    %106 = arith.subf %102, %105 : vector<5x128xf32>
    %107 = math.exp %106 : vector<5x128xf32>
    %cst_60 = arith.constant dense<0.000000e+00> : vector<128xf32>
    %108 = vector.multi_reduction <add>, %107, %cst_60 [0] : vector<5x128xf32> to vector<128xf32>
    %109 = vector.shape_cast %108 : vector<128xf32> to vector<1x128xf32>
    %110 = tpu.reciprocal %109 {approx = true} : vector<1x128xf32> -> vector<1x128xf32>
    %111 = vector.broadcast %110 : vector<1x128xf32> to vector<5x128xf32>
    %112 = arith.mulf %107, %111 : vector<5x128xf32>
    %113 = vector.extract_strided_slice %23 {offsets = [0, 0], sizes = [8, 128], strides = [1, 1]} : vector<16x128xf32> to vector<8x128xf32>
    %114 = tpu.concatenate %113, %71, %74, %52, %112 in 0 : vector<8x128xf32>, vector<1x128xf32>, vector<1x128xf32>, vector<5x128xf32>, vector<5x128xf32> -> vector<20x128xf32>
    %c0_61 = arith.constant 0 : index
    %c0_62 = arith.constant 0 : index
    %115 = vector.load %arg3[%c0_61, %c0_62] : memref<20x128xf32, #tpu.memory_space<vmem>>, vector<20x128xf32>
    tpu.vector_store %arg3[%c0_61, %c0_62], %114 {strides = array<i32>} : memref<20x128xf32, #tpu.memory_space<vmem>>, vector<20x128xf32>,
    return
  }
  func.func @transform_0(%arg0: i32) -> (i32, i32) {
    %c0_i32 = arith.constant 0 : i32
    %c0_i32_0 = arith.constant 0 : i32
    return %c0_i32, %arg0 : i32, i32
  }
  func.func @transform_1(%arg0: i32) -> (i32, i32, i32) {
    %c0_i32 = arith.constant 0 : i32
    %c0_i32_0 = arith.constant 0 : i32
    %c0_i32_1 = arith.constant 0 : i32
    %c0_i32_2 = arith.constant 0 : i32
    return %c0_i32, %c0_i32_0, %c0_i32_1 : i32, i32, i32
  }
  func.func @transform_2(%arg0: i32) -> (i32, i32) {
    %c0_i32 = arith.constant 0 : i32
    %c0_i32_0 = arith.constant 0 : i32
    return %c0_i32, %arg0 : i32, i32
  }
}

</mosaic_0001>

<bundles_post_ra>
// kernel: _dagmm_impl.1
= control target key start
LH: loop header
LB: loop body
LE: loop exit
PB: predicated region body
PF: predicated region fallthrough
CT: control target
= control target key end

     0   :  { %vm29_vm0 = vcmask 1044480   ;;  %vm24_vm1 = vcmask 39936   ;;  %v577_v0 = vmov 16   ;;  %vm71_vm2 = vcmask 130048   ;;  %s704_s1 = inlined_call_operand.vmem [shape: f32[8,16,17], index: 1, kind: input, shape index: {}]   ;;  %s705_s0 = inlined_call_operand.vmem [shape: f32[5,128], index: 0, kind: input, shape index: {}]   ;;  %s706_s2 = inlined_call_operand.vmem [shape: f32[20,128], index: 2, kind: output, shape index: {}]  }
   0x1   :  { %533 = vset.pattern.permute.xlu0 %v577_v0  ;;  %v13_v1 = vld [vmem:[%s704_s1 + $0x8] sm:$0xff]  ;;  %v602_v2 = vld [vmem:[%s705_s0] sm:$0x1f]  ;;  %534 = vset.pattern.permute.xlu1 %v577_v0  ;;  %v510_v4 = vld [vmem:[%s704_s1 + $0x38] sm:$0xff]  ;;  %v578_v45 = vmov 9   ;;  %v579_v46 = vmov 8  }
   0x2   :  { %v12_v3 = vld [vmem:[%s704_s1] sm:$0xff]  ;;  %21 = vperm.xlu0 %533, %v13_v1   ;;  %498 = vmatpush.msk.msra.mxu0 %vm29_vm0, %v602_v2  ;;  %v502_v6 = vld [vmem:[%s704_s1 + $0x18] sm:$0xff]  ;;  %v501_v7 = vld [vmem:[%s704_s1 + $0x10] sm:$0xff]  ;;  %v283_v55 = vmul.f32 %v602_v2, %v602_v2  ;;  %vm485_vm14 = vcmask 1040384  }
   0x3   :  { %499 = vmatmul.msk.f32.vlgmr.msra.gmra.mxu0 %vm24_vm1, %v12_v3  ;;  %535 = vset.pattern.permute.xlu2 %v577_v0  ;;  %v617_v5 = vld [vmem:[%s704_s1 + $0x40] sm:$0xff]  ;;  %v509_v8 = vld [vmem:[%s704_s1 + $0x30] sm:$0xff]  ;;  %v506_v18 = vld [vmem:[%s704_s1 + $0x28] sm:$0xff] }
   0x4   :  { %68 = vperm.xlu1 %534, %v502_v6   ;;  %v632_v10 = vld [vmem:[%s704_s1 + $0x50] sm:$0xff]  ;;  %111 = vperm.xlu2 %535, %v506_v18   ;;  %v505_v19 = vld [vmem:[%s704_s1 + $0x20] sm:$0xff]  ;;  %v514_v22 = vld [vmem:[%s704_s1 + $0x48] sm:$0xff]  ;;  %v284_v56 = vsel %vm29_vm0, %v283_v55, 0.0 }
   0x5   :  { %v522_v43 = vld [vmem:[%s704_s1 + $0x60] sm:$0xff]  ;;  %v523_v44 = vld [vmem:[%s704_s1 + $0x68] sm:$0xff]  ;;  %v285_v57 = vrot.slane %v284_v56, 4 }
   0x7   :  { %v286_v58 = vadd.f32 %v285_v57, %v284_v56 }
   0x9   :  { %v287_v59 = vrot.slane %v286_v58, 2 }
   0xa   :  { %16 = vperm.xlu0 %533, %v12_v3  }
   0xb   :  { %500 = vmatmul.msk.f32.gmra.mxu0 %vm24_vm1, %v13_v1  ;;  %v288_v62 = vadd.f32 %v287_v59, %v286_v58  ;;  %vm487_vm1 = vcmask 1041408  }
   0xc   :  { %63 = vperm.xlu1 %534, %v501_v7   ;;  %106 = vperm.xlu2 %535, %v505_v19  }
   0xd   :  { %v289_v1 = vrot.slane %v288_v62, 1 }
   0xf   :  { %v290_v3 = vadd.f32 %v289_v1, %v288_v62 }
  0x12   :  { %151 = vperm.xlu0 %533, %v510_v4  }
  0x14   :  { %146 = vperm.xlu1 %534, %v509_v8   ;;  %193 = vperm.xlu2 %535, %v514_v22  }
  0x1a   :  { %188 = vperm.xlu0 %533, %v617_v5  }
  0x1c   :  { %230 = vperm.xlu1 %534, %v632_v10   ;;  %536 = vset.pattern.permute.xlu2 %v579_v46 }
  0x1d   :  { %366 = vperm.xlu2 %536, %v523_v44  }
  0x22   :  { %537 = vset.pattern.permute.xlu0 %v579_v46 }
  0x23   :  { %361 = vperm.xlu0 %537, %v522_v43  }
  0x24   :  { %538 = vset.pattern.permute.xlu1 %v578_v45 }
  0x25   :  { %403 = vperm.xlu1 %538, %v523_v44   ;;  %539 = vset.pattern.permute.xlu2 %v578_v45 }
  0x26   :  { %399 = vperm.xlu2 %539, %v522_v43  }
  0x2b   :  { %542 = vset.pattern.permute.xlu0 %v577_v0 }
  0x2d   :  { %540 = vset.pattern.permute.xlu1 %v577_v0 }
  0x2e   :  { %415 = vperm.xlu1 %540, %v523_v44   ;;  %541 = vset.pattern.permute.xlu2 %v577_v0 }
  0x2f   :  { %411 = vperm.xlu2 %541, %v522_v43  }
  0x5e   :  { %v112_v29 = vpop.permute.xlu2 %111 }
  0x66   :  { %v107_v30 = vpop.permute.xlu2 %106 }
  0x6e   :  { %v194_v49 = vpop.permute.xlu2 %193 }
  0x74   :  { %v22_v9 = vpop.permute.xlu0 %21 }
  0x76   :  { %v69_v20 = vpop.permute.xlu1 %68 }
  0x7c   :  { %v17_v12 = vpop.permute.xlu0 %16 }
  0x7e   :  { %v64_v23 = vpop.permute.xlu1 %63 }
  0x80   :  { %v50_v11 = vpop.f32.mrf.mxu0 }
  0x81   :  { %v51_v14 = vadd.f32 %v50_v11, %v17_v12 }
  0x84   :  { %v152_v36 = vpop.permute.xlu0 %151 }
  0x86   :  { %v147_v37 = vpop.permute.xlu1 %146 }
  0x88   :  { %v53_v13 = vpop.f32.mrf.mxu0 }
  0x89   :  { %v54_v15 = vadd.f32 %v53_v13, %v22_v9 }
  0x8b   :  { %543 = vtanh.f32 %v54_v15 }
  0x8c   :  { %545 = vtanh.f32 %v51_v14  ;;  %v189_v48 = vpop.permute.xlu0 %188 }
  0x8e   :  { %v231_v60 = vpop.permute.xlu1 %230 }
  0x91   :  { %v544_v16 = vpop.eup %543 }
  0x92   :  { %90 = vmatpush.msra.mxu1 %v544_v16  ;;  %v546_v17 = vpop.eup %545 }
  0x94   :  { %91 = vmatpush.msra.mxu1 %v546_v17 }
  0x95   :  { %503 = vmatmul.msk.f32.vlgmr.msra.gmra.mxu1 %vm71_vm2, %v501_v7 }
  0x9d   :  { %504 = vmatmul.msk.f32.gmra.mxu1 %vm71_vm2, %v502_v6  ;;  %v315_v6 = vmax.f32 %v290_v3, 1e-16  ;;  %v404_v3 = vpop.permute.xlu1 %403 }
  0x9f   :  { %vm322_vm7 = vweird.f32 %v315_v6 }
 0x112   :  { %v93_v21 = vpop.f32.mrf.mxu1 }
 0x113   :  { %v94_v25 = vadd.f32 %v93_v21, %v64_v23 }
 0x11a   :  { %v96_v24 = vpop.f32.mrf.mxu1 }
 0x11b   :  { %v97_v26 = vadd.f32 %v96_v24, %v69_v20 }
 0x11d   :  { %547 = vtanh.f32 %v97_v26 }
 0x11e   :  { %549 = vtanh.f32 %v94_v25 }
 0x123   :  { %v548_v27 = vpop.eup %547 }
 0x124   :  { %132 = vmatpush.msra.mxu2 %v548_v27  ;;  %v550_v28 = vpop.eup %549 }
 0x126   :  { %133 = vmatpush.msra.mxu2 %v550_v28 }
 0x127   :  { %507 = vmatmul.msk.f32.vlgmr.msra.gmra.mxu2 %vm71_vm2, %v505_v19 }
 0x12f   :  { %508 = vmatmul.msk.f32.gmra.mxu2 %vm71_vm2, %v506_v18 }
 0x1aa   :  { %v135_v31 = vpop.f32.mrf.mxu2 }
 0x1ab   :  { %v136_v32 = vadd.f32 %v135_v31, %v107_v30  ;;  %v326_v30 = vand.u32 2147483647, %v315_v6 }
 0x1ad   :  { %491 = vst [vmem:[%s706_s2] sm:$0xff] %v136_v32  ;;  %vm327_vm10 = vcmp.eq.f32.partialorder %v326_v30, 8.507059e+37 }
 0x1b2   :  { %v138_v33 = vpop.f32.mrf.mxu2 }
 0x1b3   :  { %v139_v34 = vadd.f32 %v138_v33, %v112_v29  ;;  %v328_v29 = vand.u32 2147483648, %v315_v6 }
 0x1b5   :  { %172 = vmatpush.msra.mxu3 %v139_v34  ;;  %389 = vmatpush.msrb.mxu2 %v139_v34 }
 0x1b7   :  { %173 = vmatpush.msra.mxu3 %v136_v32  ;;  %390 = vmatpush.msrb.mxu2 %v136_v32 }
 0x1b8   :  { %511 = vmatmul.msk.f32.vlgmr.msra.gmra.mxu3 %vm71_vm2, %v509_v8  ;;  %524 = vmatmul.msk.f32.vlgmr.msrb.gmra.mxu2 %vm71_vm2, %v522_v43 }
 0x1c0   :  { %512 = vmatmul.msk.f32.gmra.mxu3 %vm71_vm2, %v510_v4  ;;  %525 = vmatmul.msk.f32.gmra.mxu2 %vm71_vm2, %v523_v44 }
 0x23b   :  { %v175_v35 = vpop.f32.mrf.mxu3 }
 0x23c   :  { %v176_v39 = vadd.f32 %v175_v35, %v147_v37  ;;  %v329_v37 = vor.u32 1.1754944e-38, %v328_v29 }
 0x243   :  { %v178_v38 = vpop.f32.mrf.mxu3 }
 0x244   :  { %v179_v40 = vadd.f32 %v178_v38, %v152_v36 }
 0x246   :  { %551 = vtanh.f32 %v179_v40 }
 0x247   :  { %553 = vtanh.f32 %v176_v39 }
 0x24c   :  { %v552_v41 = vpop.eup %551 }
 0x24d   :  { %214 = vmatpush.msrb.mxu0 %v552_v41  ;;  %v554_v42 = vpop.eup %553 }
 0x24f   :  { %215 = vmatpush.msrb.mxu0 %v554_v42 }
 0x250   :  { %515 = vmatmul.msk.f32.vlgmr.msrb.gmra.mxu0 %vm71_vm2, %v617_v5 }
 0x258   :  { %516 = vmatmul.msk.f32.gmra.mxu0 %vm71_vm2, %v514_v22 }
 0x2cd   :  { %v217_v47 = vpop.f32.mrf.mxu0 }
 0x2ce   :  { %v218_v51 = vadd.f32 %v217_v47, %v189_v48 }
 0x2d5   :  { %v220_v50 = vpop.f32.mrf.mxu0 }
 0x2d6   :  { %v221_v52 = vadd.f32 %v220_v50, %v194_v49 }
 0x2d8   :  { %555 = vtanh.f32 %v221_v52 }
 0x2d9   :  { %557 = vtanh.f32 %v218_v51  ;;  %v367_v51 = vpop.permute.xlu2 %366 }
 0x2de   :  { %v556_v53 = vpop.eup %555 }
 0x2df   :  { %255 = vmatpush.msrb.mxu1 %v556_v53  ;;  %v558_v54 = vpop.eup %557  ;;  %v526_v53 = vld [vmem:[%s704_s1 + $0x70] sm:$0xff] }
 0x2e0   :  { %427 = vperm.xlu0 %542, %v526_v53  }
 0x2e1   :  { %256 = vmatpush.msrb.mxu1 %v558_v54 }
 0x2e2   :  { %519 = vmatmul.msk.f32.vlgmr.msrb.gmra.mxu1 %vm71_vm2, %v632_v10 }
 0x35f   :  { %v258_v61 = vpop.f32.mrf.mxu1 }
 0x360   :  { %v259_v63 = vadd.f32 %v258_v61, %v231_v60  ;;  %v392_v60 = vpop.f32.mrf.mxu2 }
 0x362   :  { %v521_v0 = vmul.f32 -1.442695, %v259_v63 }
 0x364   :  { %559 = vpow2.f32 %v521_v0 }
 0x36a   :  { %v560_v4 = vpop.eup %559 }
 0x36b   :  { %v266_v5 = vadd.f32 1.0, %v560_v4 }
 0x36d   :  { %561 = vrcp.f32 %v266_v5  ;;  %v278_v11 = vand.u32 2147483648, %v266_v5  ;;  %v276_v13 = vand.u32 2147483647, %v266_v5  ;;  %vm272_vm4 = vweird.f32 %v266_v5 }
 0x36e   :  { %563 = vrcp.f32 %v315_v6 }
 0x36f   :  { %v279_v16 = vor.u32 1.1754944e-38, %v278_v11  ;;  %vm277_vm6 = vcmp.eq.f32.partialorder %v276_v13, 8.507059e+37 }
 0x373   :  { %v562_v7 = vpop.eup %561 }
 0x374   :  { %v268_v8 = vmul.f32 %v562_v7, %v266_v5  ;;  %v564_v9 = vpop.eup %563  ;;  %vm273_vm3 = vweird.f32 %v562_v7  ;;  %v400_v5 = vpop.permute.xlu2 %399 }
 0x375   :  { %v318_v14 = vmul.f32 %v564_v9, %v315_v6  ;;  %vm274_vm5 = vmor %vm272_vm4, %vm273_vm3  ;;  %vm323_vm8 = vweird.f32 %v564_v9 }
 0x376   :  { %v269_v10 = vsub.f32 1.0, %v268_v8  ;;  %vm324_vm9 = vmor %vm322_vm7, %vm323_vm8 }
 0x377   :  { %v319_v18 = vsub.f32 1.0, %v318_v14  ;;  %v362_v14 = vpop.permute.xlu0 %361 }
 0x378   :  { %v270_v12 = vmul.f32 %v562_v7, %v269_v10 }
 0x379   :  { %v320_v24 = vmul.f32 %v564_v9, %v319_v18 }
 0x37a   :  { %v271_v15 = vadd.f32 %v562_v7, %v270_v12 }
 0x37b   :  { %v321_v33 = vadd.f32 %v564_v9, %v320_v24 }
 0x37c   :  { %v275_v17 = vsel %vm274_vm5, %v562_v7, %v271_v15 }
 0x37d   :  { %v672_v19 = vsel %vm277_vm6, %v279_v16, %v275_v17  ;;  %v325_v40 = vsel %vm324_vm9, %v564_v9, %v321_v33  ;;  %v395_v17 = vpop.f32.mrf.mxu2 }
 0x37e   :  { %v282_v20 = vsub.f32 %v602_v2, %v672_v19  ;;  %v291_v21 = vmul.f32 %v672_v19, %v672_v19  ;;  %v307_v36 = vmul.f32 %v672_v19, %v602_v2  ;;  %v330_v44 = vsel %vm327_vm10, %v329_v37, %v325_v40 }
 0x37f   :  { %v480_v16 = vrot.slane %v672_v19, 6 }
 0x380   :  { %v292_v22 = vsel %vm29_vm0, %v291_v21, 0.0  ;;  %v299_v23 = vmul.f32 %v282_v20, %v282_v20  ;;  %v308_v43 = vsel %vm29_vm0, %v307_v36, 0.0  ;;  %v428_v36 = vpop.permute.xlu0 %427 }
 0x381   :  { %v293_v25 = vrot.slane %v292_v22, 4  ;;  %v309_v47 = vrot.slane %v308_v43, 4 }
 0x382   :  { %v300_v26 = vsel %vm29_vm0, %v299_v23, 0.0 }
 0x383   :  { %v294_v27 = vadd.f32 %v293_v25, %v292_v22  ;;  %v301_v28 = vrot.slane %v300_v26, 4  ;;  %v310_v50 = vadd.f32 %v309_v47, %v308_v43 }
 0x385   :  { %v295_v31 = vrot.slane %v294_v27, 2  ;;  %v302_v32 = vadd.f32 %v301_v28, %v300_v26  ;;  %v311_v2 = vrot.slane %v310_v50, 2  ;;  %v412_v28 = vpop.permute.xlu2 %411 }
 0x387   :  { %v296_v34 = vadd.f32 %v295_v31, %v294_v27  ;;  %v303_v35 = vrot.slane %v302_v32, 2  ;;  %v312_v57 = vadd.f32 %v311_v2, %v310_v50  ;;  %v416_v27 = vpop.permute.xlu1 %415 }
 0x389   :  { %v297_v38 = vrot.slane %v296_v34, 1  ;;  %v304_v39 = vadd.f32 %v303_v35, %v302_v32  ;;  %v313_v63 = vrot.slane %v312_v57, 1 }
 0x38b   :  { %v298_v41 = vadd.f32 %v297_v38, %v296_v34  ;;  %v305_v42 = vrot.slane %v304_v39, 1  ;;  %v314_v8 = vadd.f32 %v313_v63, %v312_v57  ;;  %v527_v34 = vld [vmem:[%s704_s1 + $0x78] sm:$0xff] }
 0x38d   :  { %v306_v45 = vadd.f32 %v305_v42, %v304_v39  ;;  %v316_v46 = vmax.f32 %v298_v41, 1e-16 }
 0x38f   :  { %v331_v48 = vmul.f32 %v330_v44, %v306_v45  ;;  %v344_v49 = vmul.f32 %v316_v46, %v315_v6  ;;  %v518_v6 = vld [vmem:[%s704_s1 + $0x58] sm:$0xff] }
 0x390   :  { %520 = vmatmul.msk.f32.gmra.mxu1 %vm71_vm2, %v518_v6 }
 0x391   :  { %565 = vrsqrt.f32 %v331_v48  ;;  %vm351_vm12 = vweird.f32 %v344_v49  ;;  %vm339_vm15 = vcmp.eq.f32.partialorder %v331_v48, inf  ;;  %v342_v10 = vand.u32 2147483648, %v331_v48 }
 0x392   :  { %567 = vrsqrt.f32 %v344_v49  ;;  %vm341_vm3 = vcmp.eq.f32.partialorder %v331_v48, 0.0 }
 0x397   :  { %v566_v52 = vpop.eup %565 }
 0x398   :  { %v568_v54 = vpop.eup %567  ;;  %v333_v55 = vmul.f32 %v566_v52, %v331_v48 }
 0x399   :  { %v346_v56 = vmul.f32 %v568_v54, %v344_v49  ;;  %vm352_vm11 = vweird.f32 %v568_v54 }
 0x39a   :  { %v334_v58 = vmul.f32 %v566_v52, %v333_v55  ;;  %vm353_vm13 = vmor %vm351_vm12, %vm352_vm11 }
 0x39b   :  { %v347_v59 = vmul.f32 %v568_v54, %v346_v56 }
 0x39c   :  { %v335_v61 = vmul.f32 0.5, %v334_v58 }
 0x39d   :  { %v348_v62 = vmul.f32 0.5, %v347_v59 }
 0x39e   :  { %v336_v0 = vsub.f32 1.5, %v335_v61 }
 0x39f   :  { %v349_v1 = vsub.f32 1.5, %v348_v62 }
 0x3a0   :  { %v337_v4 = vmul.f32 %v566_v52, %v336_v0 }
 0x3a1   :  { %v350_v7 = vmul.f32 %v568_v54, %v349_v1 }
 0x3a2   :  { %v338_v9 = vmul.f32 %v337_v4, %v331_v48 }
 0x3a3   :  { %v354_v11 = vsel %vm353_vm13, %v568_v54, %v350_v7 }
 0x3a4   :  { %v340_v12 = vsel %vm339_vm15, %v331_v48, %v338_v9  ;;  %v355_v13 = vmul.f32 %v354_v11, %v314_v8 }
 0x3a5   :  { %v343_v15 = vsel %vm341_vm3, %v342_v10, %v340_v12 }
 0x3a6   :  { %v370_v18 = vmul.f32 %v367_v51, %v343_v15  ;;  %v486_v20 = vsel %vm485_vm14, %v343_v15, %v355_v13  ;;  %v369_v22 = vmul.f32 %v362_v14, %v343_v15  ;;  %v407_v23 = vmul.f32 %v404_v3, %v355_v13 }
 0x3a7   :  { %v488_v21 = vsel %vm487_vm1, %v486_v20, %v480_v16  ;;  %v406_v25 = vmul.f32 %v400_v5, %v355_v13 }
 0x3a8   :  { %v396_v24 = vadd.f32 %v395_v17, %v370_v18  ;;  %v393_v26 = vadd.f32 %v392_v60, %v369_v22 }
 0x3aa   :  { %v409_v29 = vadd.f32 %v407_v23, %v396_v24  ;;  %v408_v30 = vadd.f32 %v406_v25, %v393_v26 }
 0x3ac   :  { %v419_v31 = vadd.f32 %v416_v27, %v409_v29  ;;  %v418_v32 = vadd.f32 %v412_v28, %v408_v30 }
 0x3ae   :  { %569 = vtanh.f32 %v419_v31 }
 0x3af   :  { %571 = vtanh.f32 %v418_v32 }
 0x3b4   :  { %v570_v33 = vpop.eup %569 }
 0x3b5   :  { %452 = vmatpush.msrb.mxu3 %v570_v33  ;;  %v572_v19 = vpop.eup %571 }
 0x3b7   :  { %453 = vmatpush.msrb.mxu3 %v572_v19 }
 0x3b8   :  { %528 = vmatmul.msk.f32.vlgmr.msrb.gmra.mxu3 %vm71_vm2, %v526_v53 }
 0x3c0   :  { %529 = vmatmul.msk.f32.gmra.mxu3 %vm71_vm2, %v527_v34  ;;  %vm489_vm2 = vcmask 1046528  }
 0x40d   :  { %v261_v35 = vpop.f32.mrf.mxu1 }
 0x43b   :  { %v455_v37 = vpop.f32.mrf.mxu3 }
 0x43c   :  { %v456_v38 = vadd.f32 %v455_v37, %v428_v36 }
 0x43e   :  { %v460_v39 = vsel %vm29_vm0, %v456_v38, -inf }
 0x43f   :  { %v461_v40 = vrot.slane %v460_v39, 4 }
 0x441   :  { %v462_v41 = vmax.f32 %v460_v39, %v461_v40 }
 0x443   :  { %v463_v42 = vrot.slane %v462_v41, 2  ;;  %v458_v43 = vpop.f32.mrf.mxu3 }
 0x445   :  { %v464_v44 = vmax.f32 %v462_v41, %v463_v42 }
 0x447   :  { %v465_v45 = vrot.slane %v464_v44, 1 }
 0x449   :  { %v466_v46 = vmax.f32 %v464_v44, %v465_v45 }
 0x44b   :  { %v467_v47 = vsub.f32 %v456_v38, %v466_v46 }
 0x44d   :  { %v468_v48 = vmul.f32 1.442695, %v467_v47 }
 0x44f   :  { %573 = vpow2.f32 %v468_v48 }
 0x455   :  { %v574_v49 = vpop.eup %573 }
 0x456   :  { %v470_v50 = vsel %vm29_vm0, %v574_v49, 0.0 }
 0x457   :  { %v471_v51 = vrot.slane %v470_v50, 4 }
 0x459   :  { %v472_v2 = vadd.f32 %v471_v51, %v470_v50 }
 0x45b   :  { %v473_v52 = vrot.slane %v472_v2, 2 }
 0x45d   :  { %v474_v53 = vadd.f32 %v473_v52, %v472_v2 }
 0x45f   :  { %v475_v54 = vrot.slane %v474_v53, 1 }
 0x461   :  { %v476_v55 = vadd.f32 %v475_v54, %v474_v53 }
 0x463   :  { %575 = vrcp.f32 %v476_v55 }
 0x469   :  { %v576_v56 = vpop.eup %575 }
 0x46a   :  { %v478_v57 = vmul.f32 %v576_v56, %v574_v49 }
 0x46c   :  { %v483_v58 = vrot.slane %v478_v57, 1 }
 0x46e   :  { %v490_v59 = vsel %vm489_vm2, %v488_v21, %v483_v58  ;;  %493 = vst [vmem:[%s706_s2 + $0x10] sm:$0xf] %v483_v58 }
 0x46f   :  { %492 = vst [vmem:[%s706_s2 + $0x8] sm:$0xff] %v490_v59 }

</bundles_post_ra>
